<compile_context>
chip_gen: v7x
topology: tpu7x:2x2x1
jax: 0.10.0
libtpu: 0.0.40
codegen_flags: <defaults>
</compile_context>

<pallas_src>
import functools

import jax
import jax.numpy as jnp
from jax import lax
from jax.experimental import pallas as pl
from jax.experimental.pallas import tpu as pltpu


def _round_up(x, m):
    return (x + m - 1) // m * m


# ----------------------------- forward kernel ------------------------------

def _forward_kernel(x_ref, w1_ref, b1_ref, w2_ref, b2_ref, logits_ref):
    # hidden = relu(x @ W1 + b1)   (bf16 operands, f32 accumulation)
    h = jnp.dot(x_ref[...], w1_ref[...], preferred_element_type=jnp.float32)
    h = jnp.maximum(h + b1_ref[...], 0.0)
    # logits = hidden @ W2 + b2    (fc layer; NCLS padded to 128 -> lane-dense store)
    logits = jnp.dot(h.astype(w2_ref.dtype), w2_ref[...],
                     preferred_element_type=jnp.float32) + b2_ref[...]
    logits_ref[...] = logits


def dig_forward(x, params):
    """DIGProtectedModule.forward == wrapped model forward. Returns logits [B, NCLS]."""
    w1, b1, w2, b2 = params
    B = x.shape[0]
    x_flat = x.reshape(B, -1)
    D = x_flat.shape[1]
    HID = w1.shape[1]
    NCLS = w2.shape[1]
    NCLS_PAD = _round_up(NCLS, 128)          # lane-dense output

    TILE_B = min(128, _round_up(B, 8))       # sublane-aligned batch tile
    B_PAD = _round_up(B, TILE_B)

    x_bf = jnp.pad(x_flat.astype(jnp.bfloat16), ((0, B_PAD - B), (0, 0)))
    w1_bf = w1.astype(jnp.bfloat16)
    w2_bf = jnp.pad(w2.astype(jnp.bfloat16), ((0, 0), (0, NCLS_PAD - NCLS)))
    b2_pad = jnp.pad(b2, ((0, 0), (0, NCLS_PAD - NCLS)))

    flops = 2 * B_PAD * D * HID + 2 * B_PAD * HID * NCLS_PAD
    bytes_accessed = (x_bf.size * 2 + w1_bf.size * 2 + w2_bf.size * 2
                      + b1.size * 4 + b2_pad.size * 4 + B_PAD * NCLS_PAD * 4)

    logits_pad = pl.pallas_call(
        _forward_kernel,
        out_shape=jax.ShapeDtypeStruct((B_PAD, NCLS_PAD), jnp.float32),
        grid=(B_PAD // TILE_B,),
        in_specs=[
            pl.BlockSpec((TILE_B, D), lambda i: (i, 0)),      # x tile per step
            pl.BlockSpec((D, HID), lambda i: (0, 0)),         # weights stay resident
            pl.BlockSpec((1, HID), lambda i: (0, 0)),
            pl.BlockSpec((HID, NCLS_PAD), lambda i: (0, 0)),
            pl.BlockSpec((1, NCLS_PAD), lambda i: (0, 0)),
        ],
        out_specs=pl.BlockSpec((TILE_B, NCLS_PAD), lambda i: (i, 0)),
        compiler_params=pltpu.CompilerParams(
            dimension_semantics=("parallel",)),
        cost_estimate=pl.CostEstimate(
            flops=flops, transcendentals=0, bytes_accessed=bytes_accessed),
    )(x_bf, w1_bf, b1, w2_bf, b2_pad)

    return logits_pad[:B, :NCLS]


# ------------------------- fused sus-score kernel ---------------------------

def _sus_kernel(batch, x_ref, w1_ref, b1_ref, w2_ref, b2_ref, o_ref, grad_acc):
    i = pl.program_id(0)

    @pl.when(i == 0)
    def _():
        grad_acc[...] = jnp.zeros_like(grad_acc)

    # ---- forward (bf16 operands, f32 accumulation); logits never leave vregs
    h = jnp.dot(x_ref[...], w1_ref[...], preferred_element_type=jnp.float32)
    h = jnp.maximum(h + b1_ref[...], 0.0)                              # [TB, HID] f32
    logits = jnp.dot(h.astype(w2_ref.dtype), w2_ref[...],
                     preferred_element_type=jnp.float32) + b2_ref[...]  # [TB, C]
    tb, ncls = logits.shape

    # ---- dL/dlogits = softmax - 1/C   (f32 on VPU/EUP; v5e has no bf16 EUP)
    m = jnp.max(logits, axis=1, keepdims=True)
    e = jnp.exp(logits - m)
    p = e / jnp.sum(e, axis=1, keepdims=True)
    g = p - (1.0 / ncls)                                               # [TB, C]

    # zero contributions from batch-padding rows (static check: only if padded)
    if batch % tb != 0:
        row = i * tb + lax.broadcasted_iota(jnp.int32, (tb, ncls), 0)
        g = jnp.where(row < batch, g, 0.0)

    # ---- dL/dW_fc = g^T @ h : contract over batch directly (no XLU transpose)
    grad_acc[...] += lax.dot_general(
        g, h, dimension_numbers=(((0,), (0,)), ((), ())),
        preferred_element_type=jnp.float32)                            # [C, HID]

    @pl.when(i == pl.num_programs(0) - 1)
    def _():
        o_ref[0, 0] = jnp.sum(jnp.abs(grad_acc[...]))


def calc_sus_score(x, params):
    """sum(|d(-1/C * sum(log_softmax(logits))) / d W_fc|), fully fused in one kernel."""
    w1, b1, w2, b2 = params
    B = x.shape[0]
    x_flat = x.reshape(B, -1)
    D = x_flat.shape[1]
    HID = w1.shape[1]
    NCLS = w2.shape[1]

    TILE_B = min(128, _round_up(B, 8))
    B_PAD = _round_up(B, TILE_B)

    x_bf = jnp.pad(x_flat.astype(jnp.bfloat16), ((0, B_PAD - B), (0, 0)))
    w1_bf = w1.astype(jnp.bfloat16)
    w2_bf = w2.astype(jnp.bfloat16)

    flops = (2 * B_PAD * D * HID + 2 * B_PAD * HID * NCLS
             + 2 * B_PAD * NCLS * HID)
    bytes_accessed = (x_bf.size * 2 + w1_bf.size * 2 + w2_bf.size * 2
                      + b1.size * 4 + b2.size * 4 + 4)

    score = pl.pallas_call(
        functools.partial(_sus_kernel, B),
        out_shape=jax.ShapeDtypeStruct((1, 1), jnp.float32),
        grid=(B_PAD // TILE_B,),
        in_specs=[
            pl.BlockSpec((TILE_B, D), lambda i: (i, 0)),
            pl.BlockSpec((D, HID), lambda i: (0, 0)),
            pl.BlockSpec((1, HID), lambda i: (0, 0)),
            pl.BlockSpec((HID, NCLS), lambda i: (0, 0)),
            pl.BlockSpec((1, NCLS), lambda i: (0, 0)),
        ],
        out_specs=pl.BlockSpec((1, 1), lambda i: (0, 0),
                               memory_space=pltpu.MemorySpace.SMEM),
        scratch_shapes=[pltpu.VMEM((NCLS, HID), jnp.float32)],   # grad accumulator
        compiler_params=pltpu.CompilerParams(
            dimension_semantics=("arbitrary",)),                 # batch reduction
        cost_estimate=pl.CostEstimate(
            flops=flops, transcendentals=B_PAD * NCLS,
            bytes_accessed=bytes_accessed),
    )(x_bf, w1_bf, b1, w2_bf, b2)
    return score[0, 0]


# --------------------------- pure-JAX references -----------------------------
# References mirror the kernel numerics: bf16 matmul operands, f32 accumulation.

def _ref_forward(x, params):
    w1, b1, w2, b2 = params
    x_flat = x.reshape(x.shape[0], -1).astype(jnp.bfloat16)
    h = jnp.maximum(
        jnp.dot(x_flat, w1.astype(jnp.bfloat16),
                preferred_element_type=jnp.float32) + b1, 0.0)
    logits = jnp.dot(h.astype(jnp.bfloat16), w2.astype(jnp.bfloat16),
                     preferred_element_type=jnp.float32) + b2
    return logits, h


def _ref_sus(x, params):
    logits, h = _ref_forward(x, params)
    C = logits.shape[1]
    p = jax.nn.softmax(logits, axis=1)
    g = p - 1.0 / C
    grad_w = g.T @ h
    return jnp.sum(jnp.abs(grad_w))


# ---------------------------------- main -------------------------------------

if __name__ == "__main__":
    # small shapes consistent with an image classifier input (NCHW)
    B, C_in, H_sp, W_sp = 2, 4, 16, 16
    D = C_in * H_sp * W_sp            # 1024 flattened features
    HID = 128                          # hidden width
    NCLS = 8                           # number of classes

    key = jax.random.PRNGKey(0)
    kx, k1, k2, k3, k4 = jax.random.split(key, 5)

    x = jax.random.normal(kx, (B, C_in, H_sp, W_sp), dtype=jnp.float32)

    # deterministic parameter init (synthetic, no checkpoint load)
    w1 = jax.random.normal(k1, (D, HID), dtype=jnp.float32) * 0.02
    b1 = jax.random.normal(k2, (1, HID), dtype=jnp.float32) * 0.01
    w2 = jax.random.normal(k3, (HID, NCLS), dtype=jnp.float32) * 0.05
    b2 = jax.random.normal(k4, (1, NCLS), dtype=jnp.float32) * 0.01
    params = (w1, b1, w2, b2)

    # forward (DIGProtectedModule.forward == model forward)
    logits = jax.block_until_ready(dig_forward(x, params))

    # sus score (DIGProtectedModule.calc_sus_score), fully fused kernel
    sus = jax.block_until_ready(calc_sus_score(x, params))

    # sanity check against pure-JAX reference (same bf16/f32 numerics)
    ref_logits, _ = _ref_forward(x, params)
    ref_sus = _ref_sus(x, params)
    assert jnp.allclose(logits, ref_logits, rtol=1e-4, atol=1e-4)
    assert jnp.allclose(sus, ref_sus, rtol=1e-4, atol=1e-4)

    print("KERNEL_OK")
</pallas_src>

<mosaic_0001>
module attributes {stable_mosaic.version = 11 : i64} {
  func.func @_forward_kernel(%arg0: i32, %arg1: memref<8x1024xbf16, #tpu.memory_space<vmem>>, %arg2: memref<1024x128xbf16, #tpu.memory_space<vmem>>, %arg3: memref<1x128xf32, #tpu.memory_space<vmem>>, %arg4: memref<128x128xbf16, #tpu.memory_space<vmem>>, %arg5: memref<1x128xf32, #tpu.memory_space<vmem>>, %arg6: memref<8x128xf32, #tpu.memory_space<vmem>>) attributes {dimension_semantics = [#tpu.dimension_semantics<parallel>], iteration_bounds = array<i64: 1>, scalar_prefetch = 0 : i64, scratch_operands = 0 : i64, tpu.core_type = #tpu.core_type<tc>, window_params = [{transform_indices = @transform_0, window_bounds = array<i64: 8, 1024>}, {pipeline_mode = #tpu.pipeline_mode<synchronous>, transform_indices = @transform_1, window_bounds = array<i64: 1024, 128>}, {pipeline_mode = #tpu.pipeline_mode<synchronous>, transform_indices = @transform_2, window_bounds = array<i64: 1, 128>}, {pipeline_mode = #tpu.pipeline_mode<synchronous>, transform_indices = @transform_3, window_bounds = array<i64: 128, 128>}, {pipeline_mode = #tpu.pipeline_mode<synchronous>, transform_indices = @transform_4, window_bounds = array<i64: 1, 128>}, {transform_indices = @transform_5, window_bounds = array<i64: 8, 128>}]} {
    %c0 = arith.constant 0 : index
    %c0_0 = arith.constant 0 : index
    %0 = vector.load %arg1[%c0, %c0_0] : memref<8x1024xbf16, #tpu.memory_space<vmem>>, vector<8x1024xbf16>
    %c0_1 = arith.constant 0 : index
    %c0_2 = arith.constant 0 : index
    %1 = vector.load %arg2[%c0_1, %c0_2] : memref<1024x128xbf16, #tpu.memory_space<vmem>>, vector<1024x128xbf16>
    %cst = arith.constant dense<0.000000e+00> : vector<8x128xf32>
    %2 = tpu.matmul %0, %1, %cst {dimension_numbers = #tpu.dot_dimension_numbers<[1], [0], [0], [1], [0, 0, 1, 1], [], []>} : vector<8x1024xbf16>, vector<1024x128xbf16>, vector<8x128xf32> -> vector<8x128xf32>
    %c0_3 = arith.constant 0 : index
    %c0_4 = arith.constant 0 : index
    %3 = vector.load %arg3[%c0_3, %c0_4] : memref<1x128xf32, #tpu.memory_space<vmem>>, vector<1x128xf32>
    %4 = vector.broadcast %3 : vector<1x128xf32> to vector<8x128xf32>
    %5 = arith.addf %2, %4 : vector<8x128xf32>
    %cst_5 = arith.constant 0.000000e+00 : f32
    %6 = vector.broadcast %cst_5 : f32 to vector<8x128xf32>
    %7 = arith.maximumf %5, %6 : vector<8x128xf32>
    %8 = arith.truncf %7 : vector<8x128xf32> to vector<8x128xbf16>
    %c0_6 = arith.constant 0 : index
    %c0_7 = arith.constant 0 : index
    %9 = vector.load %arg4[%c0_6, %c0_7] : memref<128x128xbf16, #tpu.memory_space<vmem>>, vector<128x128xbf16>
    %cst_8 = arith.constant dense<0.000000e+00> : vector<8x128xf32>
    %10 = tpu.matmul %8, %9, %cst_8 {dimension_numbers = #tpu.dot_dimension_numbers<[1], [0], [0], [1], [0, 0, 1, 1], [], []>} : vector<8x128xbf16>, vector<128x128xbf16>, vector<8x128xf32> -> vector<8x128xf32>
    %c0_9 = arith.constant 0 : index
    %c0_10 = arith.constant 0 : index
    %11 = vector.load %arg5[%c0_9, %c0_10] : memref<1x128xf32, #tpu.memory_space<vmem>>, vector<1x128xf32>
    %12 = vector.broadcast %11 : vector<1x128xf32> to vector<8x128xf32>
    %13 = arith.addf %10, %12 : vector<8x128xf32>
    %c0_11 = arith.constant 0 : index
    %c0_12 = arith.constant 0 : index
    %14 = vector.load %arg6[%c0_11, %c0_12] : memref<8x128xf32, #tpu.memory_space<vmem>>, vector<8x128xf32>
    tpu.vector_store %arg6[%c0_11, %c0_12], %13 {strides = array<i32>} : memref<8x128xf32, #tpu.memory_space<vmem>>, vector<8x128xf32>,
    return
  }
  func.func @transform_0(%arg0: i32) -> (i32, i32) {
    %c0_i32 = arith.constant 0 : i32
    %c0_i32_0 = arith.constant 0 : i32
    return %arg0, %c0_i32 : i32, i32
  }
  func.func @transform_1(%arg0: i32) -> (i32, i32) {
    %c0_i32 = arith.constant 0 : i32
    %c0_i32_0 = arith.constant 0 : i32
    %c0_i32_1 = arith.constant 0 : i32
    return %c0_i32, %c0_i32_0 : i32, i32
  }
  func.func @transform_2(%arg0: i32) -> (i32, i32) {
    %c0_i32 = arith.constant 0 : i32
    %c0_i32_0 = arith.constant 0 : i32
    %c0_i32_1 = arith.constant 0 : i32
    return %c0_i32, %c0_i32_0 : i32, i32
  }
  func.func @transform_3(%arg0: i32) -> (i32, i32) {
    %c0_i32 = arith.constant 0 : i32
    %c0_i32_0 = arith.constant 0 : i32
    %c0_i32_1 = arith.constant 0 : i32
    return %c0_i32, %c0_i32_0 : i32, i32
  }
  func.func @transform_4(%arg0: i32) -> (i32, i32) {
    %c0_i32 = arith.constant 0 : i32
    %c0_i32_0 = arith.constant 0 : i32
    %c0_i32_1 = arith.constant 0 : i32
    return %c0_i32, %c0_i32_0 : i32, i32
  }
  func.func @transform_5(%arg0: i32) -> (i32, i32) {
    %c0_i32 = arith.constant 0 : i32
    %c0_i32_0 = arith.constant 0 : i32
    return %arg0, %c0_i32 : i32, i32
  }
}

</mosaic_0001>

<bundles_post_ra>
// kernel: tpu_custom_call.1
= control target key start
LH: loop header
LB: loop body
LE: loop exit
PB: predicated region body
PF: predicated region fallthrough
CT: control target
= control target key end

     0   :  { %10 = vsyncpa [#allocation3], 0  ;;  %s1381_s0 = inlined_call_operand.hbm [shape: bf16[8,1024], index: 0, kind: input, shape index: {}]   ;;  %s1382_s1 = inlined_call_operand.hbm [shape: bf16[1024,128], index: 1, kind: input, shape index: {}]   ;;  %s1383_s2 = inlined_call_operand.vmem [shape: f32[1,128], index: 2, kind: input, shape index: {}]   ;;  %s1384_s3 = inlined_call_operand.hbm [shape: bf16[128,128], index: 3, kind: input, shape index: {}]   ;;  %s1385_s4 = inlined_call_operand.vmem [shape: f32[1,128], index: 4, kind: input, shape index: {}]   ;;  %s1386_s5 = inlined_call_operand.hbm [shape: f32[8,128], index: 5, kind: output, shape index: {}]  }
   0x1   :  { %11 = vsyncpa [#allocation6], 0 }
   0x2   :  { %12 = vsyncpa [#allocation4], 0  ;;  %s1283_s18 = smov [#allocation5]   ;;  %s1189_s22 = scalar_lea.hbm %s1382_s1, 8192 }
   0x3   :  { %s28_s19 = sshll.u32 %s1283_s18, 4  ;;  %p1190_p0 = scmp.ne.s32.totalorder %s1382_s1, %s1189_s22  ;;  %s29_s19 = int_to_ptr.vmem [resolvable:$true] %s28_s19 }
   0x4   :  { %p1193_p1 = scmp.lt.u32.totalorder %s1189_s22, %s1382_s1 }
   0x6   :  { %p1195_p2 = pnand %p1193_p1, %p1190_p0 }
   0x8   :  { %1198 = shalt.err (!%p1195_p2)
}
   0x9   :  { %s1199_s27 = scalar_lea.vmem %s29_s19, 8192  ;;  %p1204_p4 = scmp.lt.s32.totalorder %s29_s19, %s29_s19 }
   0xa   :  { %p1200_p3 = scmp.ne.s32.totalorder %s29_s19, %s1199_s27  ;;  %p1205_p5 = scmp.lt.s32.totalorder %s1199_s27, %s1199_s27 }
   0xc   :  { %p1206_p6 = por %p1205_p5, %p1204_p4 }
   0xe   :  { %p1207_p7 = pnand %p1206_p6, %p1200_p3 }
  0x10   :  { %1210 = shalt.err (!%p1207_p7)
}
  0x11   :  { %s1284_s28 = smov 64   ;;  %s1285_s29 = smov 4  }
  0x12   :  { %34 = dma.hbm_to_vmem [thread:$0]  %s1382_s1, 8192, %s29_s19, [#allocation6], %s1284_s28, %s1284_s28, %s1285_s29  }
  0x13   :  { %s1286_s7 = smov [#allocation2]   ;;  %s1287_s9 = smov [#allocation7]  }
  0x14   :  { %s19_s8 = sshll.u32 %s1286_s7, 4  ;;  %s42_s10 = sshll.u32 %s1287_s9, 4  ;;  %s20_s8 = int_to_ptr.vmem [resolvable:$true] %s19_s8  ;;  %s43_s10 = int_to_ptr.vmem [resolvable:$true] %s42_s10 }
  0x15   :  { %s1211_s13 = scalar_lea.hbm %s1381_s0, 512 }
  0x16   :  { %p1212_p8 = scmp.ne.s32.totalorder %s1381_s0, %s1211_s13  ;;  %p1215_p9 = scmp.lt.u32.totalorder %s1211_s13, %s1381_s0 }
  0x18   :  { %p1217_p10 = pnand %p1215_p9, %p1212_p8 }
  0x1a   :  { %1220 = shalt.err (!%p1217_p10)
}
  0x1b   :  { %s1221_s1 = scalar_lea.vmem %s20_s8, 512  ;;  %p1226_p12 = scmp.lt.s32.totalorder %s20_s8, %s20_s8 }
  0x1c   :  { %p1222_p11 = scmp.ne.s32.totalorder %s20_s8, %s1221_s1  ;;  %p1227_p13 = scmp.lt.s32.totalorder %s1221_s1, %s1221_s1 }
  0x1e   :  { %p1228_p0 = por %p1227_p13, %p1226_p12 }
  0x20   :  { %p1229_p1 = pnand %p1228_p0, %p1222_p11 }
  0x22   :  { %1232 = shalt.err (!%p1229_p1)
}
  0x23   :  { %22 = dma.hbm_to_vmem [thread:$0]  %s1381_s0, 512, %s20_s8, [#allocation3]  }
  0x24   :  { %s1233_s22 = scalar_lea.hbm %s1384_s3, 1024 }
  0x25   :  { %p1234_p2 = scmp.ne.s32.totalorder %s1384_s3, %s1233_s22  ;;  %p1237_p3 = scmp.lt.u32.totalorder %s1233_s22, %s1384_s3 }
  0x27   :  { %p1239_p4 = pnand %p1237_p3, %p1234_p2 }
  0x29   :  { %1242 = shalt.err (!%p1239_p4)
}
  0x2a   :  { %s1243_s27 = scalar_lea.vmem %s43_s10, 1024  ;;  %p1248_p6 = scmp.lt.s32.totalorder %s43_s10, %s43_s10 }
  0x2b   :  { %p1244_p5 = scmp.ne.s32.totalorder %s43_s10, %s1243_s27  ;;  %p1249_p7 = scmp.lt.s32.totalorder %s1243_s27, %s1243_s27 }
  0x2d   :  { %p1250_p8 = por %p1249_p7, %p1248_p6 }
  0x2f   :  { %p1251_p9 = pnand %p1250_p8, %p1244_p5 }
  0x31   :  { %1254 = shalt.err (!%p1251_p9)
}
  0x32   :  { %48 = dma.hbm_to_vmem [thread:$0]  %s1384_s3, 1024, %s43_s10, [#allocation6], %s1284_s28, %s1284_s28, %s1285_s29  }
  0x33   :  { %1277 = dma.done.wait [#allocation3], 512  }
  0x34   :  { %1278 = vsyncadd [#allocation3], 4294966784 }
  0x35   :  { %1279 = dma.done.wait [#allocation6], 9216  }
  0x36   :  { %1280 = vsyncadd [#allocation6], 4294958080  ;;  %v1109_v0 = vld [vmem:[#allocation5 + $0x40] sm:$0xff]   ;;  %v1113_v4 = vld [vmem:[#allocation5 + $0x48] sm:$0xff]   ;;  %vm1289_vm0 = vmmov 0   ;;  %s1290_s6 = smov [#allocation8]  }
  0x37   :  { %v1110_v1 = vld [vmem:[#allocation5 + $0xc0] sm:$0xff]   ;;  %984 = vmatprep.subr.bf16.mxu0 %v1109_v0  ;;  %v1114_v5 = vld [vmem:[#allocation5 + $0xc8] sm:$0xff]   ;;  %v1117_v8 = vld [vmem:[#allocation5 + $0x50] sm:$0xff]   ;;  %s892_s7 = sshll.u32 %s1290_s6, 4  ;;  %s893_s7 = int_to_ptr.vmem [resolvable:$true] %s892_s7 }
  0x38   :  { %v1111_v2 = vld [vmem:[#allocation5] sm:$0xff]   ;;  %1006 = vmatprep.subr.bf16.mxu1 %v1110_v1  ;;  %v1115_v6 = vld [vmem:[#allocation5 + $0x8] sm:$0xff]   ;;  %v1118_v9 = vld [vmem:[#allocation5 + $0xd0] sm:$0xff]   ;;  %s1255_s8 = scalar_lea.vmem %s893_s7, 128  ;;  %p1260_p11 = scmp.lt.s32.totalorder %s893_s7, %s893_s7 }
  0x39   :  { %v1112_v3 = vld [vmem:[#allocation5 + $0x80] sm:$0xff]   ;;  %985 = vmatpush3.bf16.msra.mxu0 %v1111_v2  ;;  %v1116_v7 = vld [vmem:[#allocation5 + $0x88] sm:$0xff]   ;;  %v1119_v10 = vld [vmem:[#allocation5 + $0x10] sm:$0xff]   ;;  %p1256_p10 = scmp.ne.s32.totalorder %s893_s7, %s1255_s8  ;;  %p1261_p12 = scmp.lt.s32.totalorder %s1255_s8, %s1255_s8 }
  0x3a   :  { %1007 = vmatpush3.bf16.msra.mxu1 %v1112_v3  ;;  %986 = vmatprep.subr.bf16.mxu0 %v1113_v4  ;;  %v1120_v11 = vld [vmem:[#allocation5 + $0x90] sm:$0xff]   ;;  %v1121_v12 = vld [vmem:[#allocation5 + $0x58] sm:$0xff]   ;;  %v1125_v16 = vld [vmem:[#allocation5 + $0x60] sm:$0xff]  }
  0x3b   :  { %1008 = vmatprep.subr.bf16.mxu1 %v1114_v5  ;;  %v1122_v13 = vld [vmem:[#allocation5 + $0xd8] sm:$0xff]   ;;  %v1126_v17 = vld [vmem:[#allocation5 + $0xe0] sm:$0xff]   ;;  %v1129_v20 = vld [vmem:[#allocation5 + $0x68] sm:$0xff]   ;;  %p1262_p13 = por %p1261_p12, %p1260_p11 }
  0x3c   :  { %v1123_v14 = vld [vmem:[#allocation5 + $0x18] sm:$0xff]   ;;  %v1127_v18 = vld [vmem:[#allocation5 + $0x20] sm:$0xff]   ;;  %v1130_v21 = vld [vmem:[#allocation5 + $0xe8] sm:$0xff]  }
  0x3d   :  { %987 = vmatpush3.bf16.msra.mxu0 %v1115_v6  ;;  %v1124_v15 = vld [vmem:[#allocation5 + $0x98] sm:$0xff]   ;;  %v1128_v19 = vld [vmem:[#allocation5 + $0xa0] sm:$0xff]   ;;  %v1131_v22 = vld [vmem:[#allocation5 + $0x28] sm:$0xff]   ;;  %p1263_p0 = pnand %p1262_p13, %p1256_p10 }
  0x3e   :  { %1009 = vmatpush3.bf16.msra.mxu1 %v1116_v7  ;;  %988 = vmatprep.subr.bf16.mxu0 %v1117_v8  ;;  %v1132_v23 = vld [vmem:[#allocation5 + $0xa8] sm:$0xff]   ;;  %v1133_v24 = vld [vmem:[#allocation5 + $0x70] sm:$0xff]   ;;  %v1137_v28 = vld [vmem:[#allocation5 + $0x78] sm:$0xff]  }
  0x3f   :  { %1010 = vmatprep.subr.bf16.mxu1 %v1118_v9  ;;  %v1134_v25 = vld [vmem:[#allocation5 + $0xf0] sm:$0xff]   ;;  %v1138_v29 = vld [vmem:[#allocation5 + $0xf8] sm:$0xff]   ;;  %v61_v32 = vld [vmem:[#allocation2] sm:$0xff] }
  0x40   :  { %v1135_v26 = vld [vmem:[#allocation5 + $0x30] sm:$0xff]   ;;  %v1139_v30 = vld [vmem:[#allocation5 + $0x38] sm:$0xff]   ;;  %v62_v33 = vld [vmem:[#allocation2 + $0x8] sm:$0xff]  ;;  %v903_v34 = vcombine.low %v61_v32, %v61_v32  ;;  %v904_v35 = vcombine.high %v61_v32, %v61_v32 }
  0x41   :  { %989 = vmatpush3.bf16.msra.mxu0 %v1119_v10  ;;  %v1136_v27 = vld [vmem:[#allocation5 + $0xb0] sm:$0xff]   ;;  %v1140_v31 = vld [vmem:[#allocation5 + $0xb8] sm:$0xff]   ;;  %v905_v36 = vcombine.low %v62_v33, %v62_v33  ;;  %v906_v37 = vcombine.high %v62_v33, %v62_v33  ;;  %v1145_v38 = vld [vmem:[#allocation5 + $0x140] sm:$0xff]  }
  0x42   :  { %1011 = vmatpush3.bf16.msra.mxu1 %v1120_v11  ;;  %990 = vmatprep.subr.bf16.mxu0 %v1121_v12  ;;  %v1146_v39 = vld [vmem:[#allocation5 + $0x1c0] sm:$0xff]   ;;  %v1149_v42 = vld [vmem:[#allocation5 + $0x148] sm:$0xff]   ;;  %v1153_v46 = vld [vmem:[#allocation5 + $0x150] sm:$0xff]  }
  0x43   :  { %1012 = vmatprep.subr.bf16.mxu1 %v1122_v13  ;;  %644 = vmatprep.mubr.bf16.mxu0 %v904_v35  ;;  %v1147_v40 = vld [vmem:[#allocation5 + $0x100] sm:$0xff]   ;;  %v1150_v43 = vld [vmem:[#allocation5 + $0x1c8] sm:$0xff]   ;;  %v1154_v47 = vld [vmem:[#allocation5 + $0x1d0] sm:$0xff]   ;;  %v1288_v13 = vmov 0.0  }
  0x44   :  { %684 = vmatprep.mubr.bf16.mxu1 %v906_v37  ;;  %v1148_v41 = vld [vmem:[#allocation5 + $0x180] sm:$0xff]   ;;  %v1151_v44 = vld [vmem:[#allocation5 + $0x108] sm:$0xff]   ;;  %v1155_v48 = vld [vmem:[#allocation5 + $0x110] sm:$0xff]  }
  0x45   :  { %991 = vmatpush3.bf16.msra.mxu0 %v1123_v14  ;;  %v1152_v45 = vld [vmem:[#allocation5 + $0x188] sm:$0xff]   ;;  %v1156_v49 = vld [vmem:[#allocation5 + $0x190] sm:$0xff]   ;;  %v1157_v50 = vld [vmem:[#allocation5 + $0x158] sm:$0xff]  }
  0x46   :  { %1013 = vmatpush3.bf16.msra.mxu1 %v1124_v15  ;;  %992 = vmatprep.subr.bf16.mxu0 %v1125_v16  ;;  %v1158_v51 = vld [vmem:[#allocation5 + $0x1d8] sm:$0xff]   ;;  %v1161_v54 = vld [vmem:[#allocation5 + $0x160] sm:$0xff]   ;;  %v1165_v58 = vld [vmem:[#allocation5 + $0x168] sm:$0xff]  }
  0x47   :  { %1014 = vmatprep.subr.bf16.mxu1 %v1126_v17  ;;  %v1159_v52 = vld [vmem:[#allocation5 + $0x118] sm:$0xff]   ;;  %v1162_v55 = vld [vmem:[#allocation5 + $0x1e0] sm:$0xff]   ;;  %v1166_v59 = vld [vmem:[#allocation5 + $0x1e8] sm:$0xff]  }
  0x48   :  { %v1160_v53 = vld [vmem:[#allocation5 + $0x198] sm:$0xff]   ;;  %v1163_v56 = vld [vmem:[#allocation5 + $0x120] sm:$0xff]   ;;  %v1167_v60 = vld [vmem:[#allocation5 + $0x128] sm:$0xff]  }
  0x49   :  { %993 = vmatpush3.bf16.msra.mxu0 %v1127_v18  ;;  %v1164_v57 = vld [vmem:[#allocation5 + $0x1a0] sm:$0xff]   ;;  %v1168_v61 = vld [vmem:[#allocation5 + $0x1a8] sm:$0xff]   ;;  %v1169_v62 = vld [vmem:[#allocation5 + $0x170] sm:$0xff]  }
  0x4a   :  { %1015 = vmatpush3.bf16.msra.mxu1 %v1128_v19  ;;  %994 = vmatprep.subr.bf16.mxu0 %v1129_v20  ;;  %v1170_v63 = vld [vmem:[#allocation5 + $0x1f0] sm:$0xff]   ;;  %v1173_v2 = vld [vmem:[#allocation5 + $0x178] sm:$0xff]   ;;  %v1181_v12 = vld [vmem:[#allocation7] sm:$0xff]  }
  0x4b   :  { %1016 = vmatprep.subr.bf16.mxu1 %v1130_v21  ;;  %v1171_v0 = vld [vmem:[#allocation5 + $0x130] sm:$0xff]   ;;  %v1174_v3 = vld [vmem:[#allocation5 + $0x1f8] sm:$0xff]   ;;  %v1182_v14 = vld [vmem:[#allocation7 + $0x8] sm:$0xff]  }
  0x4c   :  { %v1172_v1 = vld [vmem:[#allocation5 + $0x1b0] sm:$0xff]   ;;  %v1175_v4 = vld [vmem:[#allocation5 + $0x138] sm:$0xff]   ;;  %v1185_v17 = vld [vmem:[#allocation7 + $0x20] sm:$0xff]  }
  0x4d   :  { %995 = vmatpush3.bf16.msra.mxu0 %v1131_v22  ;;  %v1176_v5 = vld [vmem:[#allocation5 + $0x1b8] sm:$0xff]   ;;  %v63_v6 = vld [vmem:[#allocation2 + $0x10] sm:$0xff]  ;;  %v1186_v18 = vld [vmem:[#allocation7 + $0x28] sm:$0xff]  }
  0x4e   :  { %1017 = vmatpush3.bf16.msra.mxu1 %v1132_v23  ;;  %996 = vmatprep.subr.bf16.mxu0 %v1133_v24  ;;  %v907_v7 = vcombine.low %v63_v6, %v63_v6  ;;  %v908_v8 = vcombine.high %v63_v6, %v63_v6  ;;  %v64_v9 = vld [vmem:[#allocation2 + $0x18] sm:$0xff]  ;;  %v1183_v15 = vld [vmem:[#allocation7 + $0x10] sm:$0xff]   ;;  %v902_v23 = vld [vmem:[%s1383_s2] ss:$0 sm:$0xff] }
  0x4f   :  { %1018 = vmatprep.subr.bf16.mxu1 %v1134_v25  ;;  %v909_v10 = vcombine.low %v64_v9, %v64_v9  ;;  %v910_v11 = vcombine.high %v64_v9, %v64_v9  ;;  %v1184_v16 = vld [vmem:[#allocation7 + $0x18] sm:$0xff]   ;;  %v1187_v19 = vld [vmem:[#allocation7 + $0x30] sm:$0xff]  }
  0x50   :  { %v1188_v20 = vld [vmem:[#allocation7 + $0x38] sm:$0xff]  }
  0x51   :  { %997 = vmatpush3.bf16.msra.mxu0 %v1135_v26 }
  0x52   :  { %1019 = vmatpush3.bf16.msra.mxu1 %v1136_v27  ;;  %998 = vmatprep.subr.bf16.mxu0 %v1137_v28 }
  0x53   :  { %1020 = vmatprep.subr.bf16.mxu1 %v1138_v29 }
  0x55   :  { %999 = vmatpush3.bf16.msra.mxu0 %v1139_v30 }
  0x56   :  { %1021 = vmatpush3.bf16.msra.mxu1 %v1140_v31  ;;  %1028 = vmatprep.subr.bf16.mxu0 %v1145_v38 }
  0x57   :  { %1050 = vmatprep.subr.bf16.mxu1 %v1146_v39 }
  0x58   :  { %645 = vmatmul.mubr.bf16.vlgmr.msra.gmra.mrb[0].mxu0 %v903_v34 }
  0x59   :  { %685 = vmatmul.mubr.bf16.vlgmr.msra.gmra.mrb[0].mxu1 %v905_v36  ;;  %1029 = vmatpush3.bf16.msra.mxu0 %v1147_v40 }
  0x5a   :  { %1051 = vmatpush3.bf16.msra.mxu1 %v1148_v41  ;;  %1030 = vmatprep.subr.bf16.mxu0 %v1149_v42 }
  0x5b   :  { %1052 = vmatprep.subr.bf16.mxu1 %v1150_v43  ;;  %724 = vmatprep.mubr.bf16.mxu0 %v908_v8 }
  0x5c   :  { %764 = vmatprep.mubr.bf16.mxu1 %v910_v11 }
  0x5d   :  { %1031 = vmatpush3.bf16.msra.mxu0 %v1151_v44 }
  0x5e   :  { %1053 = vmatpush3.bf16.msra.mxu1 %v1152_v45  ;;  %1032 = vmatprep.subr.bf16.mxu0 %v1153_v46 }
  0x5f   :  { %1054 = vmatprep.subr.bf16.mxu1 %v1154_v47 }
  0x61   :  { %1033 = vmatpush3.bf16.msra.mxu0 %v1155_v48  ;;  %v975_v48 = vld [vmem:[%s1385_s4] ss:$0 sm:$0xff] }
  0x62   :  { %1055 = vmatpush3.bf16.msra.mxu1 %v1156_v49  ;;  %1034 = vmatprep.subr.bf16.mxu0 %v1157_v50 }
  0x63   :  { %1056 = vmatprep.subr.bf16.mxu1 %v1158_v51 }
  0x65   :  { %1035 = vmatpush3.bf16.msra.mxu0 %v1159_v52 }
  0x66   :  { %1057 = vmatpush3.bf16.msra.mxu1 %v1160_v53  ;;  %1036 = vmatprep.subr.bf16.mxu0 %v1161_v54 }
  0x67   :  { %1058 = vmatprep.subr.bf16.mxu1 %v1162_v55 }
  0x69   :  { %1037 = vmatpush3.bf16.msra.mxu0 %v1163_v56 }
  0x6a   :  { %1059 = vmatpush3.bf16.msra.mxu1 %v1164_v57  ;;  %1038 = vmatprep.subr.bf16.mxu0 %v1165_v58 }
  0x6b   :  { %1060 = vmatprep.subr.bf16.mxu1 %v1166_v59 }
  0x6d   :  { %1039 = vmatpush3.bf16.msra.mxu0 %v1167_v60 }
  0x6e   :  { %1061 = vmatpush3.bf16.msra.mxu1 %v1168_v61  ;;  %1040 = vmatprep.subr.bf16.mxu0 %v1169_v62 }
  0x6f   :  { %1062 = vmatprep.subr.bf16.mxu1 %v1170_v63 }
  0x71   :  { %1041 = vmatpush3.bf16.msra.mxu0 %v1171_v0 }
  0x72   :  { %1063 = vmatpush3.bf16.msra.mxu1 %v1172_v1  ;;  %1042 = vmatprep.subr.bf16.mxu0 %v1173_v2 }
  0x73   :  { %1064 = vmatprep.subr.bf16.mxu1 %v1174_v3 }
  0x75   :  { %1043 = vmatpush3.bf16.msra.mxu0 %v1175_v4 }
  0x76   :  { %1065 = vmatpush3.bf16.msra.mxu1 %v1176_v5  ;;  %1081 = vmatprep.subr.bf16.mxu0 %v1288_v13 }
  0x78   :  { %725 = vmatmul.mubr.bf16.vlgmr.msra.gmra.mrb[4].mxu0 %v907_v7 }
  0x79   :  { %765 = vmatmul.mubr.bf16.vlgmr.msra.gmra.mrb[4].mxu1 %v909_v10  ;;  %1082 = vmatpush3.bf16.msra.mxu0 %v1181_v12 }
  0x7a   :  { %1083 = vmatprep.subr.bf16.mxu0 %v1288_v13  ;;  %1097 = vmatprep.mubr.msk.bf16.mxu0 %vm1289_vm0, %v1288_v13 }
  0x7d   :  { %1084 = vmatpush3.bf16.msra.mxu0 %v1182_v14 }
  0x7e   :  { %1085 = vmatprep.subr.bf16.mxu0 %v1288_v13 }
  0x81   :  { %1086 = vmatpush3.bf16.msra.mxu0 %v1183_v15 }
  0x82   :  { %1087 = vmatprep.subr.bf16.mxu0 %v1288_v13 }
  0x85   :  { %1088 = vmatpush3.bf16.msra.mxu0 %v1184_v16 }
  0x86   :  { %1089 = vmatprep.subr.bf16.mxu0 %v1288_v13 }
  0x89   :  { %1090 = vmatpush3.bf16.msra.mxu0 %v1185_v17 }
  0x8a   :  { %1091 = vmatprep.subr.bf16.mxu0 %v1288_v13 }
  0x8d   :  { %1092 = vmatpush3.bf16.msra.mxu0 %v1186_v18 }
  0x8e   :  { %1093 = vmatprep.subr.bf16.mxu0 %v1288_v13 }
  0x91   :  { %1094 = vmatpush3.bf16.msra.mxu0 %v1187_v19 }
  0x92   :  { %1095 = vmatprep.subr.bf16.mxu0 %v1288_v13 }
  0x95   :  { %1096 = vmatpush3.bf16.msra.mxu0 %v1188_v20 }
 0x12b   :  { %v1000_v21 = vpop.f32.mrb[0].mxu0 }
 0x12c   :  { %v1022_v22 = vpop.f32.mrb[0].mxu1  ;;  %v1001_v24 = vpop.f32.mrb[1].mxu0 }
 0x12d   :  { %v1023_v25 = vpop.f32.mrb[1].mxu1  ;;  %v1002_v26 = vadd.f32 %v1001_v24, %v1000_v21  ;;  %v1003_v28 = vpop.f32.mrb[2].mxu0 }
 0x12e   :  { %v1024_v27 = vadd.f32 %v1023_v25, %v1022_v22  ;;  %v1025_v29 = vpop.f32.mrb[2].mxu1  ;;  %v1004_v30 = vpop.f32.mrb[3].mxu0 }
 0x12f   :  { %v1026_v31 = vpop.f32.mrb[3].mxu1  ;;  %v647_v32 = vadd.f32 %v1002_v26, %v902_v23 }
 0x131   :  { %v687_v33 = vadd.f32 %v1024_v27, %v647_v32 }
 0x14b   :  { %v1044_v34 = vpop.f32.mrb[4].mxu0 }
 0x14c   :  { %v1066_v35 = vpop.f32.mrb[4].mxu1  ;;  %v1045_v36 = vpop.f32.mrb[5].mxu0 }
 0x14d   :  { %v1067_v37 = vpop.f32.mrb[5].mxu1  ;;  %v1046_v38 = vadd.f32 %v1045_v36, %v1044_v34  ;;  %v1047_v40 = vpop.f32.mrb[6].mxu0 }
 0x14e   :  { %v1068_v39 = vadd.f32 %v1067_v37, %v1066_v35  ;;  %v1069_v41 = vpop.f32.mrb[6].mxu1  ;;  %v1048_v42 = vpop.f32.mrb[7].mxu0 }
 0x14f   :  { %v1070_v43 = vpop.f32.mrb[7].mxu1  ;;  %v727_v44 = vadd.f32 %v1046_v38, %v687_v33 }
 0x151   :  { %v767_v45 = vadd.f32 %v1068_v39, %v727_v44 }
 0x153   :  { %v772_v46 = vmax.f32 %v767_v45, 0.0 }
 0x155   :  { %v773_v47 = vpack.c.bf16 %v772_v46, %v772_v46 }
 0x157   :  { %1098 = vmatmul.mubr.bf16.vlgmr.msra.gmra.mrb[8].mxu0 %v773_v47 }
 0x22a   :  { %v879_v49 = vpop.f32.mrb[8].mxu0 }
 0x22b   :  { %v880_v50 = vadd.f32 %v975_v48, %v879_v49  ;;  %v1099_v51 = vpop.f32.mrb[9].mxu0 }
 0x22c   :  { %v882_v52 = vpop.f32.mrb[10].mxu0 }
 0x22d   :  { %885 = vst [vmem:[#allocation8] sm:$0xff] %v880_v50  ;;  %v1100_v53 = vpop.f32.mrb[11].mxu0 }
 0x22e   :  { %1266 = shalt.err (!%p1263_p0)
}
 0x22f   :  { %s1267_s4 = scalar_lea.hbm %s1386_s5, 128 }
 0x230   :  { %p1268_p1 = scmp.ne.s32.totalorder %s1386_s5, %s1267_s4  ;;  %p1271_p2 = scmp.lt.u32.totalorder %s1267_s4, %s1386_s5 }
 0x232   :  { %p1273_p3 = pnand %p1271_p2, %p1268_p1 }
 0x234   :  { %1276 = shalt.err (!%p1273_p3)
}
 0x235   :  { %895 = dma.vmem_to_hbm [thread:$0]  %s893_s7, 128, %s1386_s5, [#allocation4]  }
 0x236   :  { %1281 = dma.done.wait [#allocation4], 128  }
 0x237   :  { %1282 = vsyncadd [#allocation4], 4294967168 }
 0x238   :  { %899 = vsyncpa [#allocation3], 1 }
 0x239   :  { %900 = vsyncpa [#allocation6], 1 }
 0x23a   :  { %901 = vsyncpa [#allocation4], 1 }

</bundles_post_ra>
